<compile_context>
chip_gen: v7x
topology: tpu7x:2x2x1
jax: 0.10.0
libtpu: 0.0.40
codegen_flags: <defaults>
</compile_context>

<pallas_src>
import functools

import jax
import jax.numpy as jnp
import numpy as np
from jax.experimental import pallas as pl
from jax.experimental.pallas import tpu as pltpu


def _round_up(a, b):
    return ((a + b - 1) // b) * b


def _patch_proj_kernel(x_ref, w_ref, b_ref, o_ref):
    # x_ref: (tm, K) bf16 patch rows; w_ref: (K, Np) bf16 (VMEM-resident);
    # b_ref: (1, Np) f32; o_ref: (tm, Np) f32.
    acc = jnp.dot(x_ref[...], w_ref[...], preferred_element_type=jnp.float32)
    o_ref[...] = (acc + b_ref[...]).astype(o_ref.dtype)


def _choose_tm(m_pad, k, n_pad, budget_bytes=12 << 20):
    """Largest power-of-two row tile <= 1024 whose working set fits the budget."""
    def working_set(t):
        # double-buffered bf16 input tile + resident bf16 weight
        # + double-buffered f32 output tile + f32 bias row
        return 2 * t * k * 2 + k * n_pad * 2 + 2 * t * n_pad * 4 + n_pad * 4

    tm = 1024
    while tm > 16 and (working_set(tm) > budget_bytes or tm > m_pad):
        tm //= 2
    return max(tm, 16)


def patch_embedding(x, weight, bias, patch_size):
    """Forward pass of PatchEmbedding.

    Args:
      x: [B, C, H, W] float32 (NCHW, like PyTorch).
      weight: [d_model, C, ph, pw] (PyTorch Conv2d weight layout).
      bias: [d_model].
      patch_size: (ph, pw) with stride == kernel_size.

    Returns:
      [B, num_patches, d_model]
    """
    B, C, H, W = x.shape
    ph, pw = patch_size
    d_model = weight.shape[0]
    gh, gw = H // ph, W // pw
    num_patches = gh * gw

    # --- glue: patch extraction (pure data movement, plain JAX) ---
    # TODO(synk): could be folded into the kernel via a multi-dim BlockSpec over
    # (batch, patch-row) to save one HBM pass; kept in XLA since the in-kernel
    # flatten crosses (8,128) tile boundaries when pw < 128.
    patches = x.reshape(B, C, gh, ph, gw, pw)
    patches = jnp.transpose(patches, (0, 2, 4, 1, 3, 5))
    patches = patches.reshape(B * num_patches, C * ph * pw)

    # Conv weight [d_model, C, ph, pw] -> [K, d_model]
    w_mat = weight.reshape(d_model, C * ph * pw).T
    M, K = patches.shape
    N = d_model

    # Lane-dense output: pad N up to a multiple of 128 (no masked vst.msk).
    N_pad = _round_up(N, 128)
    # Row tiling: power-of-two tile sized to the VMEM budget; pad M to a multiple.
    tm = _choose_tm(_round_up(M, 16), K, N_pad)
    M_pad = _round_up(M, tm)

    # bf16 MXU operands (f32 accumulation + bias add stay in f32).
    patches_b = jnp.zeros((M_pad, K), jnp.bfloat16).at[:M, :].set(
        patches.astype(jnp.bfloat16))
    w_b = jnp.zeros((K, N_pad), jnp.bfloat16).at[:, :N].set(
        w_mat.astype(jnp.bfloat16))
    b_f = jnp.zeros((1, N_pad), jnp.float32).at[:, :N].set(
        bias.astype(jnp.float32).reshape(1, N))

    out = pl.pallas_call(
        _patch_proj_kernel,
        out_shape=jax.ShapeDtypeStruct((M_pad, N_pad), jnp.float32),
        grid_spec=pltpu.PrefetchScalarGridSpec(
            num_scalar_prefetch=0,
            grid=(M_pad // tm,),
            in_specs=[
                pl.BlockSpec((tm, K), lambda i: (i, 0)),     # patch rows, tiled
                pl.BlockSpec((K, N_pad), lambda i: (0, 0)),  # W resident in VMEM
                pl.BlockSpec((1, N_pad), lambda i: (0, 0)),  # bias resident
            ],
            out_specs=pl.BlockSpec((tm, N_pad), lambda i: (i, 0)),
        ),
        compiler_params=pltpu.CompilerParams(
            # M tiles are independent -> allow megacore sharding on v7x.
            dimension_semantics=("parallel",),
        ),
    )(patches_b, w_b, b_f)

    out = out[:M, :N].astype(x.dtype)
    return out.reshape(B, num_patches, d_model)


if __name__ == "__main__":
    # Module config (matches the PyTorch script's constants, small image).
    d_model = 64
    n_channels = 1
    patch_size = (16, 16)
    img_size = (32, 32)          # -> 2x2 = 4 patches
    batch = 2

    key = jax.random.PRNGKey(0)
    kx, kw, kb = jax.random.split(key, 3)

    # Deterministic parameter init (Conv2d-shaped weights).
    fan_in = n_channels * patch_size[0] * patch_size[1]
    bound = 1.0 / (fan_in ** 0.5)
    weight = jax.random.uniform(
        kw, (d_model, n_channels, patch_size[0], patch_size[1]),
        dtype=jnp.float32, minval=-bound, maxval=bound)
    bias = jax.random.uniform(
        kb, (d_model,), dtype=jnp.float32, minval=-bound, maxval=bound)

    x = jax.random.normal(
        kx, (batch, n_channels, img_size[0], img_size[1]), dtype=jnp.float32)

    fwd = jax.jit(functools.partial(patch_embedding, patch_size=patch_size))
    out = fwd(x, weight, bias)
    jax.block_until_ready(out)

    # References.
    B, C, H, W = x.shape
    gh, gw = H // patch_size[0], W // patch_size[1]
    ref_p = x.reshape(B, C, gh, patch_size[0], gw, patch_size[1])
    ref_p = jnp.transpose(ref_p, (0, 2, 4, 1, 3, 5)).reshape(B, gh * gw, -1)
    w_mat = weight.reshape(d_model, -1).T

    # Exact-semantics reference (bf16 operands, f32 accumulation) on host.
    pb = np.asarray(ref_p.astype(jnp.bfloat16).astype(jnp.float32))
    wb = np.asarray(w_mat.astype(jnp.bfloat16).astype(jnp.float32))
    ref_bf16 = pb @ wb + np.asarray(bias)

    # Full-f32 module reference (bf16 rounding accounted for by tolerance).
    ref_f32 = np.asarray(ref_p) @ np.asarray(w_mat) + np.asarray(bias)

    out_np = np.asarray(out)
    assert out.shape == (batch, gh * gw, d_model)
    assert np.allclose(out_np, ref_bf16, atol=2e-3, rtol=2e-3)
    assert np.allclose(out_np, ref_f32, atol=5e-2, rtol=5e-2)

    print("KERNEL_OK")
</pallas_src>

<mosaic_0001>
module attributes {stable_mosaic.version = 11 : i64} {
  func.func @_patch_proj_kernel(%arg0: i32, %arg1: memref<16x256xbf16, #tpu.memory_space<vmem>>, %arg2: memref<256x128xbf16, #tpu.memory_space<vmem>>, %arg3: memref<1x128xf32, #tpu.memory_space<vmem>>, %arg4: memref<16x128xf32, #tpu.memory_space<vmem>>) attributes {dimension_semantics = [#tpu.dimension_semantics<parallel>], iteration_bounds = array<i64: 1>, scalar_prefetch = 0 : i64, scratch_operands = 0 : i64, tpu.core_type = #tpu.core_type<tc>, window_params = [{transform_indices = @transform_0, window_bounds = array<i64: 16, 256>}, {pipeline_mode = #tpu.pipeline_mode<synchronous>, transform_indices = @transform_1, window_bounds = array<i64: 256, 128>}, {pipeline_mode = #tpu.pipeline_mode<synchronous>, transform_indices = @transform_2, window_bounds = array<i64: 1, 128>}, {transform_indices = @transform_3, window_bounds = array<i64: 16, 128>}]} {
    %c0 = arith.constant 0 : index
    %c0_0 = arith.constant 0 : index
    %0 = vector.load %arg1[%c0, %c0_0] : memref<16x256xbf16, #tpu.memory_space<vmem>>, vector<16x256xbf16>
    %c0_1 = arith.constant 0 : index
    %c0_2 = arith.constant 0 : index
    %1 = vector.load %arg2[%c0_1, %c0_2] : memref<256x128xbf16, #tpu.memory_space<vmem>>, vector<256x128xbf16>
    %cst = arith.constant dense<0.000000e+00> : vector<16x128xf32>
    %2 = tpu.matmul %0, %1, %cst {dimension_numbers = #tpu.dot_dimension_numbers<[1], [0], [0], [1], [0, 0, 1, 1], [], []>} : vector<16x256xbf16>, vector<256x128xbf16>, vector<16x128xf32> -> vector<16x128xf32>
    %c0_3 = arith.constant 0 : index
    %c0_4 = arith.constant 0 : index
    %3 = vector.load %arg3[%c0_3, %c0_4] : memref<1x128xf32, #tpu.memory_space<vmem>>, vector<1x128xf32>
    %4 = vector.broadcast %3 : vector<1x128xf32> to vector<16x128xf32>
    %5 = arith.addf %2, %4 : vector<16x128xf32>
    %c0_5 = arith.constant 0 : index
    %c0_6 = arith.constant 0 : index
    %6 = vector.load %arg4[%c0_5, %c0_6] : memref<16x128xf32, #tpu.memory_space<vmem>>, vector<16x128xf32>
    tpu.vector_store %arg4[%c0_5, %c0_6], %5 {strides = array<i32>} : memref<16x128xf32, #tpu.memory_space<vmem>>, vector<16x128xf32>,
    return
  }
  func.func @transform_0(%arg0: i32) -> (i32, i32) {
    %c0_i32 = arith.constant 0 : i32
    %c0_i32_0 = arith.constant 0 : i32
    return %arg0, %c0_i32 : i32, i32
  }
  func.func @transform_1(%arg0: i32) -> (i32, i32) {
    %c0_i32 = arith.constant 0 : i32
    %c0_i32_0 = arith.constant 0 : i32
    %c0_i32_1 = arith.constant 0 : i32
    return %c0_i32, %c0_i32_0 : i32, i32
  }
  func.func @transform_2(%arg0: i32) -> (i32, i32) {
    %c0_i32 = arith.constant 0 : i32
    %c0_i32_0 = arith.constant 0 : i32
    %c0_i32_1 = arith.constant 0 : i32
    return %c0_i32, %c0_i32_0 : i32, i32
  }
  func.func @transform_3(%arg0: i32) -> (i32, i32) {
    %c0_i32 = arith.constant 0 : i32
    %c0_i32_0 = arith.constant 0 : i32
    return %arg0, %c0_i32 : i32, i32
  }
}

</mosaic_0001>

<bundles_post_ra>
// kernel: patch_embedding.1
= control target key start
LH: loop header
LB: loop body
LE: loop exit
PB: predicated region body
PF: predicated region fallthrough
CT: control target
= control target key end

     0   :  { %s352_s1 = inlined_call_operand.vmem [shape: bf16[256,128], index: 1, kind: input, shape index: {}]   ;;  %s353_s0 = inlined_call_operand.vmem [shape: bf16[16,256], index: 0, kind: input, shape index: {}]   ;;  %s354_s2 = inlined_call_operand.vmem [shape: f32[1,128], index: 2, kind: input, shape index: {}]   ;;  %s355_s3 = inlined_call_operand.vmem [shape: f32[16,128], index: 3, kind: output, shape index: {}]  }
   0x1   :  { %v250_v0 = vld [vmem:[%s352_s1 + $0x40] sm:$0xff]   ;;  %v252_v2 = vld [vmem:[%s352_s1 + $0x48] sm:$0xff]   ;;  %v254_v4 = vld [vmem:[%s352_s1 + $0x50] sm:$0xff]  }
   0x2   :  { %v251_v1 = vld [vmem:[%s352_s1] sm:$0xff]   ;;  %228 = vmatprep.subr.bf16.mxu0 %v250_v0  ;;  %v253_v3 = vld [vmem:[%s352_s1 + $0x8] sm:$0xff]   ;;  %v255_v5 = vld [vmem:[%s352_s1 + $0x10] sm:$0xff]  }
   0x3   :  { %229 = vmatpush3.bf16.msra.mxu0 %v251_v1  ;;  %v256_v6 = vld [vmem:[%s352_s1 + $0x58] sm:$0xff]   ;;  %v258_v8 = vld [vmem:[%s352_s1 + $0x60] sm:$0xff]   ;;  %v260_v10 = vld [vmem:[%s352_s1 + $0x68] sm:$0xff]  }
   0x4   :  { %230 = vmatprep.subr.bf16.mxu0 %v252_v2  ;;  %v257_v7 = vld [vmem:[%s352_s1 + $0x18] sm:$0xff]   ;;  %v259_v9 = vld [vmem:[%s352_s1 + $0x20] sm:$0xff]   ;;  %v261_v12 = vld [vmem:[%s352_s1 + $0x28] sm:$0xff]  }
   0x5   :  { %v268_v11 = vld [vmem:[%s353_s0 + $0x4] ss:$8 sps:$4 sm:$0xff]   ;;  %v262_v13 = vld [vmem:[%s352_s1 + $0x70] sm:$0xff]   ;;  %v264_v15 = vld [vmem:[%s352_s1 + $0x78] sm:$0xff]  }
   0x6   :  { %194 = vmatprep.mubr.bf16.mxu0 %v268_v11  ;;  %v263_v14 = vld [vmem:[%s352_s1 + $0x30] sm:$0xff]   ;;  %v265_v16 = vld [vmem:[%s352_s1 + $0x38] sm:$0xff]   ;;  %v266_v17 = vld [vmem:[%s353_s0] ss:$8 sps:$4 sm:$0xff]  }
   0x7   :  { %231 = vmatpush3.bf16.msra.mxu0 %v253_v3  ;;  %v209_v19 = vld [vmem:[%s354_s2] ss:$0 sm:$0xff] }
   0x8   :  { %232 = vmatprep.subr.bf16.mxu0 %v254_v4 }
   0xb   :  { %233 = vmatpush3.bf16.msra.mxu0 %v255_v5 }
   0xc   :  { %234 = vmatprep.subr.bf16.mxu0 %v256_v6 }
   0xf   :  { %235 = vmatpush3.bf16.msra.mxu0 %v257_v7 }
  0x10   :  { %236 = vmatprep.subr.bf16.mxu0 %v258_v8 }
  0x13   :  { %237 = vmatpush3.bf16.msra.mxu0 %v259_v9 }
  0x14   :  { %238 = vmatprep.subr.bf16.mxu0 %v260_v10 }
  0x17   :  { %239 = vmatpush3.bf16.msra.mxu0 %v261_v12 }
  0x18   :  { %240 = vmatprep.subr.bf16.mxu0 %v262_v13 }
  0x1b   :  { %241 = vmatpush3.bf16.msra.mxu0 %v263_v14 }
  0x1c   :  { %242 = vmatprep.subr.bf16.mxu0 %v264_v15 }
  0x1f   :  { %243 = vmatpush3.bf16.msra.mxu0 %v265_v16 }
  0x22   :  { %195 = vmatmul.mubr.bf16.vlgmr.msra.gmra.mrb[0].mxu0 %v266_v17 }
  0xf5   :  { %v244_v18 = vpop.f32.mrb[0].mxu0 }
  0xf6   :  { %v245_v20 = vpop.f32.mrb[1].mxu0 }
  0xf7   :  { %v246_v21 = vadd.f32 %v245_v20, %v244_v18  ;;  %v247_v22 = vpop.f32.mrb[2].mxu0 }
  0xf8   :  { %v248_v23 = vpop.f32.mrb[3].mxu0 }
  0xf9   :  { %v197_v24 = vadd.f32 %v246_v21, %v209_v19  ;;  %v249_v25 = vadd.f32 %v248_v23, %v247_v22 }
  0xfb   :  { %203 = vst [vmem:[%s355_s3] sm:$0xff] %v197_v24  ;;  %v200_v26 = vadd.f32 %v249_v25, %v209_v19 }
  0xfd   :  { %204 = vst [vmem:[%s355_s3 + $0x8] sm:$0xff] %v200_v26 }

</bundles_post_ra>
